<compile_context>
chip_gen: v6e
topology: v6e:2x2x1
jax: 0.10.0
libtpu: 0.0.40
codegen_flags: <defaults>
</compile_context>

<pallas_src>
import functools

import jax
import jax.numpy as jnp
import numpy as np
from jax.experimental import pallas as pl
from jax.experimental.pallas import tpu as pltpu

HIDDEN_IN = 40      # self.hidden_size
H1 = 64             # linear1 out
H2 = 64             # linear2 out
NUM_CLASSES = 5     # fc out
OUT_PAD = 128       # lane-dense padded output width (multiple of 128)


def _round_up(n, m):
    return ((n + m - 1) // m) * m


def ann_kernel(x_ref, w1_ref, b1_ref, w2_ref, b2_ref, w3_ref, b3_ref, o_ref):
    """Fused 3-layer MLP: relu(x@W1+b1) -> relu(.@W2+b2) -> .@W3+b3 (padded out)."""
    x = x_ref[...]                                                      # (TB, 40)
    h1 = jnp.dot(x, w1_ref[...], preferred_element_type=jnp.float32)   # (TB, 64)
    h1 = jnp.maximum(h1 + b1_ref[...], 0.0)
    h2 = jnp.dot(h1, w2_ref[...], preferred_element_type=jnp.float32)  # (TB, 64)
    h2 = jnp.maximum(h2 + b2_ref[...], 0.0)
    out = jnp.dot(h2, w3_ref[...], preferred_element_type=jnp.float32)  # (TB, 128)
    o_ref[...] = (out + b3_ref[...]).astype(o_ref.dtype)


@functools.partial(jax.jit, static_argnames=("tb",))
def ann_forward(x, w1, b1, w2, b2, w3, b3, *, tb=512):
    B = x.shape[0]

    # Effective batch tile: multiple of 8, no larger than requested tb or the
    # (rounded-up) batch.
    tb_eff = min(tb, _round_up(B, 8))
    # v7x has 2 TensorCores: keep >=2 "parallel" grid steps when the batch
    # allows, so a single-iteration grid doesn't idle one core.
    if _round_up(B, tb_eff) // tb_eff < 2 and B > 8:
        tb_eff = min(tb_eff, _round_up(pl.cdiv(B, 2), 8))

    padded_B = _round_up(B, tb_eff)
    if padded_B != B:
        x = jnp.pad(x, ((0, padded_B - B), (0, 0)))

    # Lane-dense output: pad the 5-wide classifier to 128 zero columns so the
    # output tile's last dim is a multiple of 128 (unmasked stores). Sliced
    # back to NUM_CLASSES below.
    w3p = jnp.pad(w3, ((0, 0), (0, OUT_PAD - NUM_CLASSES)))
    b3p = jnp.pad(b3, ((0, 0), (0, OUT_PAD - NUM_CLASSES)))

    grid = (padded_B // tb_eff,)
    full = lambda shape: pl.BlockSpec(shape, lambda i: (0,) * len(shape))

    weight_bytes = 4 * (HIDDEN_IN * H1 + H1 + H1 * H2 + H2 + H2 * OUT_PAD + OUT_PAD)
    cost = pl.CostEstimate(
        flops=2 * padded_B * (HIDDEN_IN * H1 + H1 * H2 + H2 * OUT_PAD),
        transcendentals=0,
        bytes_accessed=4 * padded_B * (HIDDEN_IN + OUT_PAD) + weight_bytes,
    )

    out = pl.pallas_call(
        ann_kernel,
        out_shape=jax.ShapeDtypeStruct((padded_B, OUT_PAD), jnp.float32),
        grid_spec=pltpu.PrefetchScalarGridSpec(
            num_scalar_prefetch=0,
            grid=grid,
            in_specs=[
                pl.BlockSpec((tb_eff, HIDDEN_IN), lambda i: (i, 0)),  # x (batch-tiled)
                full((HIDDEN_IN, H1)),    # W1 (constant block index -> no re-DMA)
                full((1, H1)),            # b1
                full((H1, H2)),           # W2
                full((1, H2)),            # b2
                full((H2, OUT_PAD)),      # W3 (padded)
                full((1, OUT_PAD)),       # b3 (padded)
            ],
            out_specs=pl.BlockSpec((tb_eff, OUT_PAD), lambda i: (i, 0)),
        ),
        compiler_params=pltpu.CompilerParams(
            dimension_semantics=("parallel",),
            vmem_limit_bytes=32 * 1024 * 1024,
        ),
        cost_estimate=cost,
    )(x, w1, b1, w2, b2, w3p, b3p)

    return out[:B, :NUM_CLASSES]


def init_linear(key, fan_in, fan_out):
    """Deterministic init mimicking torch.nn.Linear default U(-1/sqrt(in), 1/sqrt(in))."""
    kw, kb = jax.random.split(key)
    bound = 1.0 / np.sqrt(fan_in)
    w = jax.random.uniform(kw, (fan_in, fan_out), jnp.float32, -bound, bound)
    b = jax.random.uniform(kb, (1, fan_out), jnp.float32, -bound, bound)
    return w, b


def reference_forward(x, w1, b1, w2, b2, w3, b3):
    h1 = jnp.maximum(x @ w1 + b1, 0.0)
    h2 = jnp.maximum(h1 @ w2 + b2, 0.0)
    return h2 @ w3 + b3


if __name__ == "__main__":
    key = jax.random.PRNGKey(0)
    kx, k1, k2, k3, kx2 = jax.random.split(key, 5)

    w1, b1 = init_linear(k1, HIDDEN_IN, H1)
    w2, b2 = init_linear(k2, H1, H2)
    w3, b3 = init_linear(k3, H2, NUM_CLASSES)

    # Small batch (single grid step, no padding needed).
    B = 8
    x = jax.random.normal(kx, (B, HIDDEN_IN), jnp.float32)
    out = jax.block_until_ready(ann_forward(x, w1, b1, w2, b2, w3, b3))
    ref = reference_forward(x, w1, b1, w2, b2, w3, b3)
    np.testing.assert_allclose(np.asarray(out), np.asarray(ref),
                               rtol=1e-5, atol=1e-5)

    # Ragged batch: exercises batch padding, multi-step parallel grid and the
    # lane-dense output slicing path.
    B2 = 200
    x2 = jax.random.normal(kx2, (B2, HIDDEN_IN), jnp.float32)
    out2 = jax.block_until_ready(ann_forward(x2, w1, b1, w2, b2, w3, b3))
    ref2 = reference_forward(x2, w1, b1, w2, b2, w3, b3)
    np.testing.assert_allclose(np.asarray(out2), np.asarray(ref2),
                               rtol=1e-5, atol=1e-5)

    print("KERNEL_OK")
</pallas_src>

<mosaic_0001>
module attributes {stable_mosaic.version = 11 : i64} {
  func.func @ann_kernel(%arg0: i32, %arg1: memref<8x40xf32, #tpu.memory_space<vmem>>, %arg2: memref<40x64xf32, #tpu.memory_space<vmem>>, %arg3: memref<1x64xf32, #tpu.memory_space<vmem>>, %arg4: memref<64x64xf32, #tpu.memory_space<vmem>>, %arg5: memref<1x64xf32, #tpu.memory_space<vmem>>, %arg6: memref<64x128xf32, #tpu.memory_space<vmem>>, %arg7: memref<1x128xf32, #tpu.memory_space<vmem>>, %arg8: memref<8x128xf32, #tpu.memory_space<vmem>>) attributes {dimension_semantics = [#tpu.dimension_semantics<parallel>], iteration_bounds = array<i64: 1>, scalar_prefetch = 0 : i64, scratch_operands = 0 : i64, tpu.core_type = #tpu.core_type<tc>, window_params = [{transform_indices = @transform_0, window_bounds = array<i64: 8, 40>}, {pipeline_mode = #tpu.pipeline_mode<synchronous>, transform_indices = @transform_1, window_bounds = array<i64: 40, 64>}, {pipeline_mode = #tpu.pipeline_mode<synchronous>, transform_indices = @transform_2, window_bounds = array<i64: 1, 64>}, {pipeline_mode = #tpu.pipeline_mode<synchronous>, transform_indices = @transform_3, window_bounds = array<i64: 64, 64>}, {pipeline_mode = #tpu.pipeline_mode<synchronous>, transform_indices = @transform_4, window_bounds = array<i64: 1, 64>}, {pipeline_mode = #tpu.pipeline_mode<synchronous>, transform_indices = @transform_5, window_bounds = array<i64: 64, 128>}, {pipeline_mode = #tpu.pipeline_mode<synchronous>, transform_indices = @transform_6, window_bounds = array<i64: 1, 128>}, {transform_indices = @transform_7, window_bounds = array<i64: 8, 128>}]} {
    %c0 = arith.constant 0 : index
    %c0_0 = arith.constant 0 : index
    %0 = vector.load %arg1[%c0, %c0_0] : memref<8x40xf32, #tpu.memory_space<vmem>>, vector<8x40xf32>
    %c0_1 = arith.constant 0 : index
    %c0_2 = arith.constant 0 : index
    %1 = vector.load %arg2[%c0_1, %c0_2] : memref<40x64xf32, #tpu.memory_space<vmem>>, vector<40x64xf32>
    %cst = arith.constant dense<0.000000e+00> : vector<8x64xf32>
    %2 = tpu.matmul %0, %1, %cst {dimension_numbers = #tpu.dot_dimension_numbers<[1], [0], [0], [1], [0, 0, 1, 1], [], []>} : vector<8x40xf32>, vector<40x64xf32>, vector<8x64xf32> -> vector<8x64xf32>
    %c0_3 = arith.constant 0 : index
    %c0_4 = arith.constant 0 : index
    %3 = vector.load %arg3[%c0_3, %c0_4] : memref<1x64xf32, #tpu.memory_space<vmem>>, vector<1x64xf32>
    %4 = vector.broadcast %3 : vector<1x64xf32> to vector<8x64xf32>
    %5 = arith.addf %2, %4 : vector<8x64xf32>
    %cst_5 = arith.constant 0.000000e+00 : f32
    %6 = vector.broadcast %cst_5 : f32 to vector<8x64xf32>
    %7 = arith.maximumf %5, %6 : vector<8x64xf32>
    %c0_6 = arith.constant 0 : index
    %c0_7 = arith.constant 0 : index
    %8 = vector.load %arg4[%c0_6, %c0_7] : memref<64x64xf32, #tpu.memory_space<vmem>>, vector<64x64xf32>
    %cst_8 = arith.constant dense<0.000000e+00> : vector<8x64xf32>
    %9 = tpu.matmul %7, %8, %cst_8 {dimension_numbers = #tpu.dot_dimension_numbers<[1], [0], [0], [1], [0, 0, 1, 1], [], []>} : vector<8x64xf32>, vector<64x64xf32>, vector<8x64xf32> -> vector<8x64xf32>
    %c0_9 = arith.constant 0 : index
    %c0_10 = arith.constant 0 : index
    %10 = vector.load %arg5[%c0_9, %c0_10] : memref<1x64xf32, #tpu.memory_space<vmem>>, vector<1x64xf32>
    %11 = vector.broadcast %10 : vector<1x64xf32> to vector<8x64xf32>
    %12 = arith.addf %9, %11 : vector<8x64xf32>
    %cst_11 = arith.constant 0.000000e+00 : f32
    %13 = vector.broadcast %cst_11 : f32 to vector<8x64xf32>
    %14 = arith.maximumf %12, %13 : vector<8x64xf32>
    %c0_12 = arith.constant 0 : index
    %c0_13 = arith.constant 0 : index
    %15 = vector.load %arg6[%c0_12, %c0_13] : memref<64x128xf32, #tpu.memory_space<vmem>>, vector<64x128xf32>
    %cst_14 = arith.constant dense<0.000000e+00> : vector<8x128xf32>
    %16 = tpu.matmul %14, %15, %cst_14 {dimension_numbers = #tpu.dot_dimension_numbers<[1], [0], [0], [1], [0, 0, 1, 1], [], []>} : vector<8x64xf32>, vector<64x128xf32>, vector<8x128xf32> -> vector<8x128xf32>
    %c0_15 = arith.constant 0 : index
    %c0_16 = arith.constant 0 : index
    %17 = vector.load %arg7[%c0_15, %c0_16] : memref<1x128xf32, #tpu.memory_space<vmem>>, vector<1x128xf32>
    %18 = vector.broadcast %17 : vector<1x128xf32> to vector<8x128xf32>
    %19 = arith.addf %16, %18 : vector<8x128xf32>
    %c0_17 = arith.constant 0 : index
    %c0_18 = arith.constant 0 : index
    %20 = vector.load %arg8[%c0_17, %c0_18] : memref<8x128xf32, #tpu.memory_space<vmem>>, vector<8x128xf32>
    tpu.vector_store %arg8[%c0_17, %c0_18], %19 {strides = array<i32>} : memref<8x128xf32, #tpu.memory_space<vmem>>, vector<8x128xf32>,
    return
  }
  func.func @transform_0(%arg0: i32) -> (i32, i32) {
    %c0_i32 = arith.constant 0 : i32
    %c0_i32_0 = arith.constant 0 : i32
    return %arg0, %c0_i32 : i32, i32
  }
  func.func @transform_1(%arg0: i32) -> (i32, i32) {
    %c0_i32 = arith.constant 0 : i32
    %c0_i32_0 = arith.constant 0 : i32
    %c0_i32_1 = arith.constant 0 : i32
    return %c0_i32, %c0_i32_0 : i32, i32
  }
  func.func @transform_2(%arg0: i32) -> (i32, i32) {
    %c0_i32 = arith.constant 0 : i32
    %c0_i32_0 = arith.constant 0 : i32
    %c0_i32_1 = arith.constant 0 : i32
    return %c0_i32, %c0_i32_0 : i32, i32
  }
  func.func @transform_3(%arg0: i32) -> (i32, i32) {
    %c0_i32 = arith.constant 0 : i32
    %c0_i32_0 = arith.constant 0 : i32
    %c0_i32_1 = arith.constant 0 : i32
    return %c0_i32, %c0_i32_0 : i32, i32
  }
  func.func @transform_4(%arg0: i32) -> (i32, i32) {
    %c0_i32 = arith.constant 0 : i32
    %c0_i32_0 = arith.constant 0 : i32
    %c0_i32_1 = arith.constant 0 : i32
    return %c0_i32, %c0_i32_0 : i32, i32
  }
  func.func @transform_5(%arg0: i32) -> (i32, i32) {
    %c0_i32 = arith.constant 0 : i32
    %c0_i32_0 = arith.constant 0 : i32
    %c0_i32_1 = arith.constant 0 : i32
    return %c0_i32, %c0_i32_0 : i32, i32
  }
  func.func @transform_6(%arg0: i32) -> (i32, i32) {
    %c0_i32 = arith.constant 0 : i32
    %c0_i32_0 = arith.constant 0 : i32
    %c0_i32_1 = arith.constant 0 : i32
    return %c0_i32, %c0_i32_0 : i32, i32
  }
  func.func @transform_7(%arg0: i32) -> (i32, i32) {
    %c0_i32 = arith.constant 0 : i32
    %c0_i32_0 = arith.constant 0 : i32
    return %arg0, %c0_i32 : i32, i32
  }
}

</mosaic_0001>

<bundles_post_ra>
// kernel: ann_forward.1
= control target key start
LH: loop header
LB: loop body
LE: loop exit
PB: predicated region body
PF: predicated region fallthrough
CT: control target
= control target key end

     0   :  { %v414_v1 = vmov 0.0   ;;  %vm415_vm0 = vmmov 0   ;;  %s564_s0 = inlined_call_operand.vmem [shape: f32[8,40], index: 0, kind: input, shape index: {}]   ;;  %s565_s1 = inlined_call_operand.vmem [shape: f32[40,64], index: 1, kind: input, shape index: {}]   ;;  %s566_s2 = inlined_call_operand.vmem [shape: f32[1,64], index: 2, kind: input, shape index: {}]   ;;  %s567_s3 = inlined_call_operand.vmem [shape: f32[64,64], index: 3, kind: input, shape index: {}]   ;;  %s568_s4 = inlined_call_operand.vmem [shape: f32[1,64], index: 4, kind: input, shape index: {}]   ;;  %s569_s5 = inlined_call_operand.vmem [shape: f32[64,128], index: 5, kind: input, shape index: {}]   ;;  %s570_s6 = inlined_call_operand.vmem [shape: f32[1,128], index: 6, kind: input, shape index: {}]   ;;  %s571_s7 = inlined_call_operand.hbm [shape: f32[8,128], index: 7, kind: output, shape index: {}]  }
   0x1   :  { %v32_v0 = vld [vmem:[%s565_s1 + $0x20] sm:$0xff]  ;;  %338 = vmatprep.subr.mxu0 %v414_v1  ;;  %v31_v2 = vld [vmem:[%s565_s1 + $0x18] sm:$0xff]  ;;  %348 = vmatprep.mubr.msk.f32.mxu0 %vm415_vm0, %v414_v1  ;;  %v121_v4 = vld [vmem:[%s567_s3 + $0x30] sm:$0xff] }
   0x2   :  { %339 = vmatpush3.msra.mxu0 %v32_v0  ;;  %351 = vmatprep.subr.mxu1 %v414_v1  ;;  %v122_v3 = vld [vmem:[%s567_s3 + $0x38] sm:$0xff]  ;;  %v30_v5 = vld [vmem:[%s565_s1 + $0x10] sm:$0xff]  ;;  %v120_v6 = vld [vmem:[%s567_s3 + $0x28] sm:$0xff] }
   0x3   :  { %340 = vmatprep.subr.mxu0 %v414_v1  ;;  %352 = vmatpush3.msra.mxu1 %v122_v3 }
   0x4   :  { %341 = vmatpush3.msra.mxu0 %v31_v2  ;;  %353 = vmatprep.subr.mxu1 %v414_v1 }
   0x5   :  { %12 = vsyncpa [#allocation3], 0  ;;  %342 = vmatprep.subr.mxu0 %v414_v1  ;;  %v29_v7 = vld [vmem:[%s565_s1 + $0x8] sm:$0xff]  ;;  %354 = vmatpush3.msra.mxu1 %v121_v4  ;;  %v119_v8 = vld [vmem:[%s567_s3 + $0x20] sm:$0xff]  ;;  %vm40_vm1 = vcmask 326656   ;;  %vm130_vm2 = vcmask 523264  }
   0x6   :  { %343 = vmatpush3.msra.mxu0 %v30_v5  ;;  %355 = vmatprep.subr.mxu1 %v414_v1  ;;  %v28_v9 = vld [vmem:[%s565_s1] sm:$0xff]  ;;  %v118_v11 = vld [vmem:[%s567_s3 + $0x18] sm:$0xff]  ;;  %v117_v12 = vld [vmem:[%s567_s3 + $0x10] sm:$0xff]  ;;  %s416_s1 = smov [#allocation2]  }
   0x7   :  { %344 = vmatprep.subr.mxu0 %v414_v1  ;;  %356 = vmatpush3.msra.mxu1 %v120_v6  ;;  %v27_v10 = vld [vmem:[%s564_s0] sm:$0xff]  ;;  %v116_v13 = vld [vmem:[%s567_s3 + $0x8] sm:$0xff]  ;;  %v212_v15 = vld [vmem:[%s569_s5 + $0x38] sm:$0xff]  ;;  %s300_s23 = sshll.u32 %s416_s1, 4  ;;  %s301_s23 = int_to_ptr.vmem [resolvable:$true] %s300_s23 }
   0x8   :  { %345 = vmatpush3.msra.mxu0 %v29_v7  ;;  %357 = vmatprep.subr.mxu1 %v414_v1  ;;  %v115_v14 = vld [vmem:[%s567_s3] sm:$0xff]  ;;  %v211_v16 = vld [vmem:[%s569_s5 + $0x30] sm:$0xff]  ;;  %v210_v17 = vld [vmem:[%s569_s5 + $0x28] sm:$0xff]  ;;  %p397_p1 = scmp.lt.s32.totalorder %s301_s23, %s301_s23 }
   0x9   :  { %346 = vmatprep.subr.mxu0 %v414_v1  ;;  %358 = vmatpush3.msra.mxu1 %v119_v8  ;;  %v209_v18 = vld [vmem:[%s569_s5 + $0x20] sm:$0xff]  ;;  %v208_v19 = vld [vmem:[%s569_s5 + $0x18] sm:$0xff]  ;;  %v207_v25 = vld [vmem:[%s569_s5 + $0x10] sm:$0xff] }
   0xa   :  { %347 = vmatpush3.msra.mxu0 %v28_v9  ;;  %359 = vmatprep.subr.mxu1 %v414_v1  ;;  %v308_v20 = vld [vmem:[%s566_s2] ss:$0 sm:$0xff]  ;;  %v206_v26 = vld [vmem:[%s569_s5 + $0x8] sm:$0xff] }
   0xb   :  { %349 = vmatmul.mubr.msk.f32.vlgmr.msra.gmra.mxu0 %vm40_vm1, %v27_v10  ;;  %360 = vmatpush3.msra.mxu1 %v118_v11  ;;  %v205_v27 = vld [vmem:[%s569_s5] sm:$0xff]  ;;  %s392_s5 = scalar_lea.vmem %s301_s23, 128 }
   0xc   :  { %361 = vmatprep.subr.mxu1 %v414_v1  ;;  %367 = vmatprep.mubr.msk.f32.mxu1 %vm415_vm0, %v414_v1  ;;  %v310_v28 = vld [vmem:[%s568_s4] ss:$0 sm:$0xff]  ;;  %p393_p0 = scmp.ne.s32.totalorder %s301_s23, %s392_s5  ;;  %p398_p2 = scmp.lt.s32.totalorder %s392_s5, %s392_s5 }
   0xd   :  { %370 = vmatprep.subr.mxu0 %v414_v1  ;;  %386 = vmatprep.mubr.msk.f32.mxu0 %vm415_vm0, %v414_v1  ;;  %v312_v33 = vld [vmem:[%s570_s6] ss:$0 sm:$0xff] }
   0xe   :  { %362 = vmatpush3.msra.mxu1 %v117_v12  ;;  %371 = vmatpush3.msra.mxu0 %v212_v15  ;;  %p399_p3 = por %p398_p2, %p397_p1 }
   0xf   :  { %363 = vmatprep.subr.mxu1 %v414_v1  ;;  %372 = vmatprep.subr.mxu0 %v414_v1 }
  0x10   :  { %364 = vmatpush3.msra.mxu1 %v116_v13  ;;  %373 = vmatpush3.msra.mxu0 %v211_v16  ;;  %p400_p4 = pnand %p399_p3, %p393_p0 }
  0x11   :  { %365 = vmatprep.subr.mxu1 %v414_v1  ;;  %374 = vmatprep.subr.mxu0 %v414_v1 }
  0x12   :  { %366 = vmatpush3.msra.mxu1 %v115_v14  ;;  %375 = vmatpush3.msra.mxu0 %v210_v17 }
  0x13   :  { %376 = vmatprep.subr.mxu0 %v414_v1 }
  0x14   :  { %377 = vmatpush3.msra.mxu0 %v209_v18 }
  0x15   :  { %378 = vmatprep.subr.mxu0 %v414_v1 }
  0x16   :  { %379 = vmatpush3.msra.mxu0 %v208_v19 }
  0x17   :  { %380 = vmatprep.subr.mxu0 %v414_v1 }
  0x18   :  { %381 = vmatpush3.msra.mxu0 %v207_v25 }
  0x19   :  { %382 = vmatprep.subr.mxu0 %v414_v1 }
  0x1a   :  { %383 = vmatpush3.msra.mxu0 %v206_v26 }
  0x1b   :  { %384 = vmatprep.subr.mxu0 %v414_v1 }
  0x1c   :  { %385 = vmatpush3.msra.mxu0 %v205_v27 }
  0xcb   :  { %v110_v21 = vpop.f32.mrf.mxu0 }
  0xcc   :  { %v111_v22 = vadd.f32 %v308_v20, %v110_v21 }
  0xcd   :  { %v350_v23 = vpop.f32.mrf.mxu0 }
  0xce   :  { %v114_v24 = vmax.f32 %v111_v22, 0.0 }
  0xd0   :  { %368 = vmatmul.mubr.msk.f32.vlgmr.msra.gmra.mxu1 %vm130_vm2, %v114_v24 }
 0x190   :  { %v200_v29 = vpop.f32.mrf.mxu1 }
 0x191   :  { %v201_v30 = vadd.f32 %v310_v28, %v200_v29 }
 0x192   :  { %v369_v31 = vpop.f32.mrf.mxu1 }
 0x193   :  { %v204_v32 = vmax.f32 %v201_v30, 0.0 }
 0x195   :  { %387 = vmatmul.mubr.msk.f32.vlgmr.msra.gmra.mxu0 %vm130_vm2, %v204_v32 }
 0x255   :  { %v289_v34 = vpop.f32.mrf.mxu0 }
 0x256   :  { %v290_v35 = vadd.f32 %v312_v33, %v289_v34 }
 0x257   :  { %v388_v36 = vpop.f32.mrf.mxu0 }
 0x258   :  { %293 = vst [vmem:[#allocation2] sm:$0xff] %v290_v35 }
 0x259   :  { %403 = shalt.err (!%p400_p4)
}
 0x25a   :  { %303 = dma.vmem_to_hbm [thread:$0]  %s301_s23, 128, %s571_s7, [#allocation3]  }
 0x25b   :  { %412 = dma.done.wait [#allocation3], 128  }
 0x25c   :  { %413 = vsyncadd [#allocation3], 4294967168 }
 0x25d   :  { %307 = vsyncpa [#allocation3], 1 }

</bundles_post_ra>
